<compile_context>
chip_gen: v6e
topology: v6e:2x2x1
jax: 0.10.0
libtpu: 0.0.40
codegen_flags: <defaults>
</compile_context>

<pallas_src>
import functools

import jax
import jax.numpy as jnp
from jax.experimental import pallas as pl
from jax.experimental.pallas import tpu as pltpu


def _round_up(x, m):
    return ((x + m - 1) // m) * m


def _ngnn_fused_kernel(x_ref, w_ref, o_ref, *, compute_dtype):
    """One (tm, N) output tile: all L (matmul -> ReLU) layers fused."""
    num_layers = w_ref.shape[0]
    h = x_ref[...]
    for layer in range(num_layers):  # static unroll; L is small
        acc = jnp.dot(
            h.astype(compute_dtype),
            w_ref[layer].astype(compute_dtype),
            preferred_element_type=jnp.float32,
        )
        h = jnp.maximum(acc, 0.0)  # ReLU on the f32 MXU result
    o_ref[...] = h.astype(o_ref.dtype)


@functools.partial(jax.jit, static_argnames=("tm", "compute_dtype"))
def _ngnn_fused(emb, w_stack, *, tm, compute_dtype):
    M, K = emb.shape
    L, Kw, N = w_stack.shape
    assert Kw == K

    # Row-tile selection: multiple of 8 (sublanes), no larger than padded M,
    # and >= 2 tiles when M allows it (keeps both v7x TensorCores busy).
    tm = max(8, min(tm, _round_up(M, 8)))
    tm = _round_up(tm, 8)
    if pl.cdiv(M, tm) < 2 and M > 8:
        tm = _round_up(pl.cdiv(M, 2), 8)
    m_pad = _round_up(M, tm)
    if m_pad != M:
        emb = jnp.pad(emb, ((0, m_pad - M), (0, 0)))
    grid_m = m_pad // tm

    bytes_accessed = (
        m_pad * K * emb.dtype.itemsize          # x read
        + L * K * N * w_stack.dtype.itemsize    # weight slab read (once)
        + m_pad * N * emb.dtype.itemsize        # out write
    )

    out = pl.pallas_call(
        functools.partial(_ngnn_fused_kernel, compute_dtype=compute_dtype),
        out_shape=jax.ShapeDtypeStruct((m_pad, N), emb.dtype),
        grid_spec=pltpu.PrefetchScalarGridSpec(
            num_scalar_prefetch=0,
            grid=(grid_m,),
            in_specs=[
                pl.BlockSpec((tm, K), lambda i: (i, 0)),
                # Constant block index -> whole weight stack stays VMEM-resident.
                pl.BlockSpec((L, K, N), lambda i: (0, 0, 0)),
            ],
            out_specs=pl.BlockSpec((tm, N), lambda i: (i, 0)),
        ),
        compiler_params=pltpu.CompilerParams(
            dimension_semantics=("parallel",),
        ),
        cost_estimate=pl.CostEstimate(
            flops=2 * m_pad * K * N * L,
            transcendentals=0,
            bytes_accessed=bytes_accessed,
        ),
    )(emb, w_stack)
    return out[:M] if m_pad != M else out


def ngnn_mlp_forward(emb, weights, *, dropout_rate=0.0, tm=512,
                     compute_dtype=jnp.bfloat16):
    """NGNNMLP.forward: repeated (matmul -> ReLU), then dropout (p=0 -> identity).

    Weights are stacked and cast once to the bf16 matmul compute dtype; the
    whole layer stack then runs inside a single fused Pallas kernel.
    """
    if len(weights) == 0:
        return emb  # no layers: dropout(p=0.0) of the input
    if len(weights) > 1:
        # Composing layers requires square, identically-shaped weights, exactly
        # as the PyTorch module implicitly does.
        assert all(w.shape == weights[0].shape for w in weights)
        assert weights[0].shape[0] == weights[0].shape[1]
    w_stack = jnp.stack(weights).astype(compute_dtype)
    out = _ngnn_fused(emb, w_stack, tm=tm, compute_dtype=compute_dtype)
    # TODO(synk): training-mode dropout (p > 0) would need pltpu.prng_random_bits;
    # with the module default p = 0.0 / eval mode it is the identity.
    del dropout_rate
    return out


def xavier_uniform_relu(key, in_feat, out_feat, dtype=jnp.float32):
    """nn.init.xavier_uniform_ with gain=calculate_gain('relu')=sqrt(2)."""
    gain = jnp.sqrt(2.0)
    bound = gain * jnp.sqrt(6.0 / (in_feat + out_feat))
    return jax.random.uniform(
        key, (in_feat, out_feat), dtype=dtype, minval=-bound, maxval=bound
    )


if __name__ == "__main__":
    # Small shapes consistent with the module: num_nodes x in_feat embeddings,
    # square 128x128 weights so two NGNN layers compose. num_nodes is
    # deliberately NOT a multiple of the row tile to exercise the padding path,
    # and tm=256 gives two parallel M tiles (v7x megacore).
    num_nodes = 500
    in_feat = out_feat = 128
    layer_number = 2

    key = jax.random.PRNGKey(0)
    k_emb, *k_ws = jax.random.split(key, 1 + layer_number)

    emb = jax.random.normal(k_emb, (num_nodes, in_feat), dtype=jnp.float32)
    weights = [
        xavier_uniform_relu(k_ws[i], in_feat, out_feat) for i in range(layer_number)
    ]

    out = ngnn_mlp_forward(emb, weights, tm=256)
    out = jax.block_until_ready(out)
    assert out.shape == (num_nodes, out_feat)
    assert out.dtype == emb.dtype

    # Plain-JAX reference with the same bf16-matmul / f32-accumulate recipe.
    ref = emb
    for w in weights:
        ref = jnp.maximum(
            jnp.dot(
                ref.astype(jnp.bfloat16),
                w.astype(jnp.bfloat16),
                preferred_element_type=jnp.float32,
            ),
            0.0,
        )
    ref = ref.astype(emb.dtype)
    assert jnp.allclose(out, ref, atol=1e-3, rtol=1e-3), float(
        jnp.max(jnp.abs(out - ref))
    )

    print("KERNEL_OK")
</pallas_src>

<mosaic_0001>
module attributes {stable_mosaic.version = 11 : i64} {
  func.func @_ngnn_fused_kernel(%arg0: i32, %arg1: memref<256x128xf32, #tpu.memory_space<vmem>>, %arg2: memref<2x128x128xbf16, #tpu.memory_space<vmem>>, %arg3: memref<256x128xf32, #tpu.memory_space<vmem>>) attributes {dimension_semantics = [#tpu.dimension_semantics<parallel>], iteration_bounds = array<i64: 2>, scalar_prefetch = 0 : i64, scratch_operands = 0 : i64, tpu.core_type = #tpu.core_type<tc>, window_params = [{transform_indices = @transform_0, window_bounds = array<i64: 256, 128>}, {pipeline_mode = #tpu.pipeline_mode<synchronous>, transform_indices = @transform_1, window_bounds = array<i64: 2, 128, 128>}, {transform_indices = @transform_2, window_bounds = array<i64: 256, 128>}]} {
    %c0 = arith.constant 0 : index
    %c0_0 = arith.constant 0 : index
    %0 = vector.load %arg1[%c0, %c0_0] : memref<256x128xf32, #tpu.memory_space<vmem>>, vector<256x128xf32>
    %1 = arith.truncf %0 : vector<256x128xf32> to vector<256x128xbf16>
    %c0_1 = arith.constant 0 : index
    %c0_2 = arith.constant 0 : index
    %c0_3 = arith.constant 0 : index
    %2 = vector.load %arg2[%c0_1, %c0_2, %c0_3] : memref<2x128x128xbf16, #tpu.memory_space<vmem>>, vector<1x128x128xbf16>
    %3 = vector.shape_cast %2 : vector<1x128x128xbf16> to vector<128x128xbf16>
    %cst = arith.constant dense<0.000000e+00> : vector<256x128xf32>
    %4 = tpu.matmul %1, %3, %cst {dimension_numbers = #tpu.dot_dimension_numbers<[1], [0], [0], [1], [0, 0, 1, 1], [], []>} : vector<256x128xbf16>, vector<128x128xbf16>, vector<256x128xf32> -> vector<256x128xf32>
    %cst_4 = arith.constant 0.000000e+00 : f32
    %5 = vector.broadcast %cst_4 : f32 to vector<256x128xf32>
    %6 = arith.maximumf %4, %5 : vector<256x128xf32>
    %7 = arith.truncf %6 : vector<256x128xf32> to vector<256x128xbf16>
    %c1 = arith.constant 1 : index
    %c0_5 = arith.constant 0 : index
    %c0_6 = arith.constant 0 : index
    %8 = vector.load %arg2[%c1, %c0_5, %c0_6] : memref<2x128x128xbf16, #tpu.memory_space<vmem>>, vector<1x128x128xbf16>
    %9 = vector.shape_cast %8 : vector<1x128x128xbf16> to vector<128x128xbf16>
    %cst_7 = arith.constant dense<0.000000e+00> : vector<256x128xf32>
    %10 = tpu.matmul %7, %9, %cst_7 {dimension_numbers = #tpu.dot_dimension_numbers<[1], [0], [0], [1], [0, 0, 1, 1], [], []>} : vector<256x128xbf16>, vector<128x128xbf16>, vector<256x128xf32> -> vector<256x128xf32>
    %cst_8 = arith.constant 0.000000e+00 : f32
    %11 = vector.broadcast %cst_8 : f32 to vector<256x128xf32>
    %12 = arith.maximumf %10, %11 : vector<256x128xf32>
    %c0_9 = arith.constant 0 : index
    %c0_10 = arith.constant 0 : index
    %13 = vector.load %arg3[%c0_9, %c0_10] : memref<256x128xf32, #tpu.memory_space<vmem>>, vector<256x128xf32>
    tpu.vector_store %arg3[%c0_9, %c0_10], %12 {strides = array<i32>} : memref<256x128xf32, #tpu.memory_space<vmem>>, vector<256x128xf32>,
    return
  }
  func.func @transform_0(%arg0: i32) -> (i32, i32) {
    %c0_i32 = arith.constant 0 : i32
    %c0_i32_0 = arith.constant 0 : i32
    return %arg0, %c0_i32 : i32, i32
  }
  func.func @transform_1(%arg0: i32) -> (i32, i32, i32) {
    %c0_i32 = arith.constant 0 : i32
    %c0_i32_0 = arith.constant 0 : i32
    %c0_i32_1 = arith.constant 0 : i32
    %c0_i32_2 = arith.constant 0 : i32
    return %c0_i32, %c0_i32_0, %c0_i32_1 : i32, i32, i32
  }
  func.func @transform_2(%arg0: i32) -> (i32, i32) {
    %c0_i32 = arith.constant 0 : i32
    %c0_i32_0 = arith.constant 0 : i32
    return %arg0, %c0_i32 : i32, i32
  }
}

</mosaic_0001>

<bundles_post_ra>
// kernel: _ngnn_fused.1
= control target key start
LH: loop header
LB: loop body
LE: loop exit
PB: predicated region body
PF: predicated region fallthrough
CT: control target
= control target key end

     0   :  { %s1049_s9 = smov 0   ;;  %s1189_s0 = inlined_call_operand.vmem [shape: f32[512,128], index: 0, kind: input, shape index: {}]   ;;  %s1190_s1 = inlined_call_operand.vmem [shape: bf16[2,128,128], index: 1, kind: input, shape index: {}]   ;;  %s1191_s2 = inlined_call_operand.vmem [shape: f32[512,128], index: 2, kind: output, shape index: {}]  }
   0x1 LB: > { %s815_s10 = sadd.s32 4294967295, %s1032_s9   ;;  %p819_p0 = scmp.ge.s32.totalorder %s1032_s9, 1  ;;  %s1032_s9 = sphi %s1049_s9, %s12_s9  }
   0x2   : > { %p113_p1 = scmp.lt.s32.totalorder %s1032_s9, 3 }
   0x4   : > { %p114_p2 = pnand %p819_p0, %p113_p1 }
   0x5   : > { %s820_s13 = sshll.u32 (!%p114_p2), %s815_s10, 5 }
   0x6   : > { %117 = sbr.rel (%p114_p2) target bundleno = 506 (0x1fa), region = 28  ;;  %p136_p3 = scmp.lt.s32.totalorder (!%p114_p2), %s820_s13, 63 }
   0xb   : > { %v1010_v0 = vld [vmem:[%s1190_s1 + $0x38] sm:$0xff]   ;;  %v1011_v1 = vld [vmem:[%s1190_s1 + $0x30] sm:$0xff]   ;;  %s1193_s13 = smov (!%p136_p3, %s820_s13), 63  ;;  %v1012_v2 = vld [vmem:[%s1190_s1 + $0x28] sm:$0xff]  }
   0xc   : > { %906 = vmatprep.subr.bf16.mxu0 %v1010_v0  ;;  %s821_s18 = sshll.u32 %s1193_s13, 3  ;;  %v1013_v3 = vld [vmem:[%s1190_s1 + $0x20] sm:$0xff]   ;;  %v1014_v7 = vld [vmem:[%s1190_s1 + $0x18] sm:$0xff]   ;;  %v1015_v8 = vld [vmem:[%s1190_s1 + $0x10] sm:$0xff]  }
   0xd   : > { %907 = vmatpush3.bf16.msra.mxu0 %v1010_v0  ;;  %s1074_s21 = scalar_lea.vmem %s1189_s0, %s821_s18  ;;  %v1016_v9 = vld [vmem:[%s1190_s1 + $0x8] sm:$0xff]   ;;  %v1018_v10 = vld [vmem:[%s1190_s1 + $0x78] sm:$0xff]   ;;  %v1019_v11 = vld [vmem:[%s1190_s1 + $0x70] sm:$0xff]   ;;  %s1152_s25 = scalar_lea.vmem %s1191_s2, %s821_s18 }
   0xe   : > { %908 = vmatprep.subr.bf16.mxu0 %v1011_v1  ;;  %v148_v4 = vld [vmem:[%s1074_s21] sm:$0xff]  ;;  %v149_v5 = vld [vmem:[%s1074_s21 + $0x8] sm:$0xff]  ;;  %954 = vmatprep.subr.bf16.mxu1 %v1018_v10  ;;  %v150_v14 = vld [vmem:[%s1074_s21 + $0x10] sm:$0xff] }
   0xf   : > { %v180_v6 = vpack.c.bf16 %v149_v5, %v148_v4  ;;  %v1017_v12 = vld [vmem:[%s1190_s1] sm:$0xff]   ;;  %955 = vmatpush3.bf16.msra.mxu1 %v1018_v10  ;;  %v1020_v13 = vld [vmem:[%s1190_s1 + $0x68] sm:$0xff]   ;;  %v151_v15 = vld [vmem:[%s1074_s21 + $0x18] sm:$0xff] }
  0x10   : > { %956 = vmatprep.subr.bf16.mxu1 %v1019_v11  ;;  %v1021_v16 = vld [vmem:[%s1190_s1 + $0x60] sm:$0xff]   ;;  %v153_v18 = vld [vmem:[%s1074_s21 + $0x28] sm:$0xff]  ;;  %v181_v19 = vpack.c.bf16 %v151_v15, %v150_v14  ;;  %v1022_v21 = vld [vmem:[%s1190_s1 + $0x58] sm:$0xff]  }
  0x11   : > { %909 = vmatpush3.bf16.msra.mxu0 %v1011_v1  ;;  %922 = vmatprep.mubr.bf16.mxu0 %v180_v6  ;;  %v152_v17 = vld [vmem:[%s1074_s21 + $0x20] sm:$0xff]  ;;  %v154_v22 = vld [vmem:[%s1074_s21 + $0x30] sm:$0xff]  ;;  %v155_v23 = vld [vmem:[%s1074_s21 + $0x38] sm:$0xff] }
  0x12   : > { %910 = vmatprep.subr.bf16.mxu0 %v1012_v2  ;;  %v182_v20 = vpack.c.bf16 %v153_v18, %v152_v17  ;;  %v156_v24 = vld [vmem:[%s1074_s21 + $0x40] sm:$0xff]  ;;  %v157_v25 = vld [vmem:[%s1074_s21 + $0x48] sm:$0xff]  ;;  %v183_v26 = vpack.c.bf16 %v155_v23, %v154_v22  ;;  %v158_v28 = vld [vmem:[%s1074_s21 + $0x50] sm:$0xff] }
  0x13   : > { %957 = vmatpush3.bf16.msra.mxu1 %v1019_v11  ;;  %v184_v27 = vpack.c.bf16 %v157_v25, %v156_v24  ;;  %v159_v29 = vld [vmem:[%s1074_s21 + $0x58] sm:$0xff]  ;;  %v160_v30 = vld [vmem:[%s1074_s21 + $0x60] sm:$0xff]  ;;  %v161_v31 = vld [vmem:[%s1074_s21 + $0x68] sm:$0xff] }
  0x14   : > { %958 = vmatprep.subr.bf16.mxu1 %v1020_v13  ;;  %v185_v32 = vpack.c.bf16 %v159_v29, %v158_v28  ;;  %v186_v33 = vpack.c.bf16 %v161_v31, %v160_v30  ;;  %v162_v34 = vld [vmem:[%s1074_s21 + $0x70] sm:$0xff]  ;;  %v163_v35 = vld [vmem:[%s1074_s21 + $0x78] sm:$0xff]  ;;  %v164_v36 = vld [vmem:[%s1074_s21 + $0x80] sm:$0xff] }
  0x15   : > { %911 = vmatpush3.bf16.msra.mxu0 %v1012_v2  ;;  %v165_v37 = vld [vmem:[%s1074_s21 + $0x88] sm:$0xff]  ;;  %v187_v38 = vpack.c.bf16 %v163_v35, %v162_v34  ;;  %v166_v40 = vld [vmem:[%s1074_s21 + $0x90] sm:$0xff]  ;;  %v167_v41 = vld [vmem:[%s1074_s21 + $0x98] sm:$0xff] }
  0x16   : > { %912 = vmatprep.subr.bf16.mxu0 %v1013_v3  ;;  %v188_v39 = vpack.c.bf16 %v165_v37, %v164_v36  ;;  %v168_v42 = vld [vmem:[%s1074_s21 + $0xa0] sm:$0xff]  ;;  %v169_v43 = vld [vmem:[%s1074_s21 + $0xa8] sm:$0xff]  ;;  %v189_v44 = vpack.c.bf16 %v167_v41, %v166_v40  ;;  %v170_v46 = vld [vmem:[%s1074_s21 + $0xb0] sm:$0xff] }
  0x17   : > { %959 = vmatpush3.bf16.msra.mxu1 %v1020_v13  ;;  %v190_v45 = vpack.c.bf16 %v169_v43, %v168_v42  ;;  %v171_v47 = vld [vmem:[%s1074_s21 + $0xb8] sm:$0xff]  ;;  %v172_v48 = vld [vmem:[%s1074_s21 + $0xc0] sm:$0xff]  ;;  %v173_v49 = vld [vmem:[%s1074_s21 + $0xc8] sm:$0xff] }
  0x18   : > { %960 = vmatprep.subr.bf16.mxu1 %v1021_v16  ;;  %v191_v50 = vpack.c.bf16 %v171_v47, %v170_v46  ;;  %v192_v51 = vpack.c.bf16 %v173_v49, %v172_v48  ;;  %v174_v52 = vld [vmem:[%s1074_s21 + $0xd0] sm:$0xff]  ;;  %v175_v53 = vld [vmem:[%s1074_s21 + $0xd8] sm:$0xff]  ;;  %v176_v54 = vld [vmem:[%s1074_s21 + $0xe0] sm:$0xff] }
  0x19   : > { %913 = vmatpush3.bf16.msra.mxu0 %v1013_v3  ;;  %v177_v55 = vld [vmem:[%s1074_s21 + $0xe8] sm:$0xff]  ;;  %v193_v56 = vpack.c.bf16 %v175_v53, %v174_v52  ;;  %v178_v58 = vld [vmem:[%s1074_s21 + $0xf0] sm:$0xff]  ;;  %v179_v59 = vld [vmem:[%s1074_s21 + $0xf8] sm:$0xff] }
  0x1a   : > { %914 = vmatprep.subr.bf16.mxu0 %v1014_v7  ;;  %v194_v57 = vpack.c.bf16 %v177_v55, %v176_v54  ;;  %v195_v60 = vpack.c.bf16 %v179_v59, %v178_v58  ;;  %v1023_v61 = vld [vmem:[%s1190_s1 + $0x50] sm:$0xff]   ;;  %v1024_v62 = vld [vmem:[%s1190_s1 + $0x48] sm:$0xff]   ;;  %v1025_v63 = vld [vmem:[%s1190_s1 + $0x40] sm:$0xff]  }
  0x1b   : > { %961 = vmatpush3.bf16.msra.mxu1 %v1021_v16 }
  0x1c   : > { %962 = vmatprep.subr.bf16.mxu1 %v1022_v21 }
  0x1d   : > { %915 = vmatpush3.bf16.msra.mxu0 %v1014_v7 }
  0x1e   : > { %916 = vmatprep.subr.bf16.mxu0 %v1015_v8 }
  0x1f   : > { %963 = vmatpush3.bf16.msra.mxu1 %v1022_v21 }
  0x20   : > { %964 = vmatprep.subr.bf16.mxu1 %v1023_v61 }
  0x21   : > { %917 = vmatpush3.bf16.msra.mxu0 %v1015_v8 }
  0x22   : > { %918 = vmatprep.subr.bf16.mxu0 %v1016_v9 }
  0x23   : > { %965 = vmatpush3.bf16.msra.mxu1 %v1023_v61 }
  0x24   : > { %966 = vmatprep.subr.bf16.mxu1 %v1024_v62 }
  0x25   : > { %919 = vmatpush3.bf16.msra.mxu0 %v1016_v9 }
  0x26   : > { %920 = vmatprep.subr.bf16.mxu0 %v1017_v12 }
  0x27   : > { %967 = vmatpush3.bf16.msra.mxu1 %v1024_v62 }
  0x28   : > { %968 = vmatprep.subr.bf16.mxu1 %v1025_v63 }
  0x29   : > { %921 = vmatpush3.bf16.msra.mxu0 %v1017_v12 }
  0x2b   : > { %969 = vmatpush3.bf16.msra.mxu1 %v1025_v63 }
  0x2c   : > { %923 = vmatmul.mubr.bf16.vlgmr.msra.gmra.mxu0 %v181_v19 }
  0x2d   : > { %926 = vmatprep.mubr.bf16.mxu0 %v182_v20 }
  0x34   : > { %927 = vmatmul.mubr.bf16.gmra.mxu0 %v183_v26 }
  0x35   : > { %930 = vmatprep.mubr.bf16.mxu0 %v184_v27 }
  0x3c   : > { %931 = vmatmul.mubr.bf16.gmra.mxu0 %v185_v32 }
  0x3d   : > { %934 = vmatprep.mubr.bf16.mxu0 %v186_v33 }
  0x44   : > { %935 = vmatmul.mubr.bf16.gmra.mxu0 %v187_v38 }
  0x45   : > { %938 = vmatprep.mubr.bf16.mxu0 %v188_v39 }
  0x4c   : > { %939 = vmatmul.mubr.bf16.gmra.mxu0 %v189_v44 }
  0x4d   : > { %942 = vmatprep.mubr.bf16.mxu0 %v190_v45 }
  0x54   : > { %943 = vmatmul.mubr.bf16.gmra.mxu0 %v191_v50 }
  0x55   : > { %946 = vmatprep.mubr.bf16.mxu0 %v192_v51 }
  0x5c   : > { %947 = vmatmul.mubr.bf16.gmra.mxu0 %v193_v56 }
  0x5d   : > { %950 = vmatprep.mubr.bf16.mxu0 %v194_v57 }
  0x64   : > { %951 = vmatmul.mubr.bf16.gmra.mxu0 %v195_v60 }
  0xec   : > { %v924_v0 = vpop.f32.mrf.mxu0 }
  0xed   : > { %v423_v7 = vmax.f32 %v924_v0, 0.0 }
  0xee   : > { %v294_v1 = vpop.f32.mrf.mxu0 }
  0xef   : > { %v421_v5 = vmax.f32 %v294_v1, 0.0 }
  0xf0   : > { %v925_v2 = vpop.f32.mrf.mxu0 }
  0xf1   : > { %v424_v3 = vmax.f32 %v925_v2, 0.0 }
  0xf2   : > { %v297_v4 = vpop.f32.mrf.mxu0 }
  0xf3   : > { %v422_v6 = vmax.f32 %v297_v4, 0.0  ;;  %v454_v10 = vpack.c.bf16 %v424_v3, %v423_v7 }
  0xf4   : > { %v928_v8 = vpop.f32.mrf.mxu0 }
  0xf5   : > { %v453_v9 = vpack.c.bf16 %v422_v6, %v421_v5  ;;  %v427_v17 = vmax.f32 %v928_v8, 0.0 }
  0xf6   : > { %v310_v11 = vpop.f32.mrf.mxu0 }
  0xf7   : > { %970 = vmatprep.mubr.bf16.mxu1 %v453_v9  ;;  %v425_v15 = vmax.f32 %v310_v11, 0.0 }
  0xf8   : > { %v929_v12 = vpop.f32.mrf.mxu0  ;;  %971 = vmatmul.mubr.bf16.vlgmr.msra.gmra.mxu1 %v454_v10 }
  0xf9   : > { %v428_v13 = vmax.f32 %v929_v12, 0.0 }
  0xfa   : > { %v313_v14 = vpop.f32.mrf.mxu0 }
  0xfb   : > { %v426_v16 = vmax.f32 %v313_v14, 0.0  ;;  %v456_v20 = vpack.c.bf16 %v428_v13, %v427_v17 }
  0xfc   : > { %v932_v18 = vpop.f32.mrf.mxu0 }
  0xfd   : > { %v455_v19 = vpack.c.bf16 %v426_v16, %v425_v15  ;;  %v431_v27 = vmax.f32 %v932_v18, 0.0 }
  0xfe   : > { %v326_v21 = vpop.f32.mrf.mxu0 }
  0xff   : > { %974 = vmatprep.mubr.bf16.mxu1 %v455_v19  ;;  %v429_v25 = vmax.f32 %v326_v21, 0.0 }
 0x100   : > { %v933_v22 = vpop.f32.mrf.mxu0  ;;  %975 = vmatmul.mubr.bf16.gmra.mxu1 %v456_v20 }
 0x101   : > { %v432_v23 = vmax.f32 %v933_v22, 0.0 }
 0x102   : > { %v329_v24 = vpop.f32.mrf.mxu0 }
 0x103   : > { %v430_v26 = vmax.f32 %v329_v24, 0.0  ;;  %v458_v30 = vpack.c.bf16 %v432_v23, %v431_v27 }
 0x104   : > { %v936_v28 = vpop.f32.mrf.mxu0 }
 0x105   : > { %v457_v29 = vpack.c.bf16 %v430_v26, %v429_v25  ;;  %v435_v37 = vmax.f32 %v936_v28, 0.0 }
 0x106   : > { %v342_v31 = vpop.f32.mrf.mxu0 }
 0x107   : > { %978 = vmatprep.mubr.bf16.mxu1 %v457_v29  ;;  %v433_v35 = vmax.f32 %v342_v31, 0.0 }
 0x108   : > { %v937_v32 = vpop.f32.mrf.mxu0  ;;  %979 = vmatmul.mubr.bf16.gmra.mxu1 %v458_v30 }
 0x109   : > { %v436_v33 = vmax.f32 %v937_v32, 0.0 }
 0x10a   : > { %v345_v34 = vpop.f32.mrf.mxu0 }
 0x10b   : > { %v434_v36 = vmax.f32 %v345_v34, 0.0  ;;  %v460_v40 = vpack.c.bf16 %v436_v33, %v435_v37 }
 0x10c   : > { %v940_v38 = vpop.f32.mrf.mxu0 }
 0x10d   : > { %v459_v39 = vpack.c.bf16 %v434_v36, %v433_v35  ;;  %v439_v47 = vmax.f32 %v940_v38, 0.0 }
 0x10e   : > { %v358_v41 = vpop.f32.mrf.mxu0 }
 0x10f   : > { %982 = vmatprep.mubr.bf16.mxu1 %v459_v39  ;;  %v437_v45 = vmax.f32 %v358_v41, 0.0 }
 0x110   : > { %v941_v42 = vpop.f32.mrf.mxu0  ;;  %983 = vmatmul.mubr.bf16.gmra.mxu1 %v460_v40 }
 0x111   : > { %v440_v43 = vmax.f32 %v941_v42, 0.0 }
 0x112   : > { %v361_v44 = vpop.f32.mrf.mxu0 }
 0x113   : > { %v438_v46 = vmax.f32 %v361_v44, 0.0  ;;  %v462_v50 = vpack.c.bf16 %v440_v43, %v439_v47 }
 0x114   : > { %v944_v48 = vpop.f32.mrf.mxu0 }
 0x115   : > { %v461_v49 = vpack.c.bf16 %v438_v46, %v437_v45  ;;  %v443_v57 = vmax.f32 %v944_v48, 0.0 }
 0x116   : > { %v374_v51 = vpop.f32.mrf.mxu0 }
 0x117   : > { %986 = vmatprep.mubr.bf16.mxu1 %v461_v49  ;;  %v441_v55 = vmax.f32 %v374_v51, 0.0 }
 0x118   : > { %v945_v52 = vpop.f32.mrf.mxu0  ;;  %987 = vmatmul.mubr.bf16.gmra.mxu1 %v462_v50 }
 0x119   : > { %v444_v53 = vmax.f32 %v945_v52, 0.0 }
 0x11a   : > { %v377_v54 = vpop.f32.mrf.mxu0 }
 0x11b   : > { %v442_v56 = vmax.f32 %v377_v54, 0.0  ;;  %v464_v60 = vpack.c.bf16 %v444_v53, %v443_v57 }
 0x11c   : > { %v948_v58 = vpop.f32.mrf.mxu0 }
 0x11d   : > { %v463_v59 = vpack.c.bf16 %v442_v56, %v441_v55  ;;  %v447_v3 = vmax.f32 %v948_v58, 0.0 }
 0x11e   : > { %v390_v61 = vpop.f32.mrf.mxu0 }
 0x11f   : > { %990 = vmatprep.mubr.bf16.mxu1 %v463_v59  ;;  %v445_v1 = vmax.f32 %v390_v61, 0.0 }
 0x120   : > { %v949_v62 = vpop.f32.mrf.mxu0  ;;  %991 = vmatmul.mubr.bf16.gmra.mxu1 %v464_v60 }
 0x121   : > { %v448_v63 = vmax.f32 %v949_v62, 0.0 }
 0x122   : > { %v393_v0 = vpop.f32.mrf.mxu0 }
 0x123   : > { %v446_v2 = vmax.f32 %v393_v0, 0.0  ;;  %v466_v6 = vpack.c.bf16 %v448_v63, %v447_v3 }
 0x124   : > { %v952_v4 = vpop.f32.mrf.mxu0 }
 0x125   : > { %v465_v5 = vpack.c.bf16 %v446_v2, %v445_v1  ;;  %v451_v13 = vmax.f32 %v952_v4, 0.0 }
 0x126   : > { %v406_v7 = vpop.f32.mrf.mxu0 }
 0x127   : > { %994 = vmatprep.mubr.bf16.mxu1 %v465_v5  ;;  %v449_v11 = vmax.f32 %v406_v7, 0.0 }
 0x128   : > { %v953_v8 = vpop.f32.mrf.mxu0  ;;  %995 = vmatmul.mubr.bf16.gmra.mxu1 %v466_v6 }
 0x129   : > { %v452_v9 = vmax.f32 %v953_v8, 0.0 }
 0x12a   : > { %v409_v10 = vpop.f32.mrf.mxu0 }
 0x12b   : > { %v450_v12 = vmax.f32 %v409_v10, 0.0  ;;  %v468_v15 = vpack.c.bf16 %v452_v9, %v451_v13 }
 0x12d   : > { %v467_v14 = vpack.c.bf16 %v450_v12, %v449_v11 }
 0x12f   : > { %998 = vmatprep.mubr.bf16.mxu1 %v467_v14 }
 0x130   : > { %999 = vmatmul.mubr.bf16.gmra.mxu1 %v468_v15 }
 0x1b8   : > { %v972_v16 = vpop.f32.mrf.mxu1 }
 0x1b9   : > { %v697_v17 = vmax.f32 %v972_v16, 0.0 }
 0x1ba   : > { %v568_v18 = vpop.f32.mrf.mxu1 }
 0x1bb   : > { %729 = vst [vmem:[%s1152_s25 + $0x10] sm:$0xff] %v697_v17  ;;  %v695_v19 = vmax.f32 %v568_v18, 0.0 }
 0x1bc   : > { %v973_v20 = vpop.f32.mrf.mxu1 }
 0x1bd   : > { %727 = vst [vmem:[%s1152_s25] sm:$0xff] %v695_v19  ;;  %v698_v21 = vmax.f32 %v973_v20, 0.0 }
 0x1be   : > { %v571_v22 = vpop.f32.mrf.mxu1 }
 0x1bf   : > { %730 = vst [vmem:[%s1152_s25 + $0x18] sm:$0xff] %v698_v21  ;;  %v696_v23 = vmax.f32 %v571_v22, 0.0 }
 0x1c0   : > { %v976_v24 = vpop.f32.mrf.mxu1 }
 0x1c1   : > { %728 = vst [vmem:[%s1152_s25 + $0x8] sm:$0xff] %v696_v23  ;;  %v701_v25 = vmax.f32 %v976_v24, 0.0 }
 0x1c2   : > { %v584_v26 = vpop.f32.mrf.mxu1 }
 0x1c3   : > { %733 = vst [vmem:[%s1152_s25 + $0x30] sm:$0xff] %v701_v25  ;;  %v699_v27 = vmax.f32 %v584_v26, 0.0 }
 0x1c4   : > { %v977_v28 = vpop.f32.mrf.mxu1 }
 0x1c5   : > { %731 = vst [vmem:[%s1152_s25 + $0x20] sm:$0xff] %v699_v27  ;;  %v702_v29 = vmax.f32 %v977_v28, 0.0 }
 0x1c6   : > { %v587_v30 = vpop.f32.mrf.mxu1 }
 0x1c7   : > { %734 = vst [vmem:[%s1152_s25 + $0x38] sm:$0xff] %v702_v29  ;;  %v700_v31 = vmax.f32 %v587_v30, 0.0 }
 0x1c8   : > { %v980_v32 = vpop.f32.mrf.mxu1 }
 0x1c9   : > { %732 = vst [vmem:[%s1152_s25 + $0x28] sm:$0xff] %v700_v31  ;;  %v705_v33 = vmax.f32 %v980_v32, 0.0 }
 0x1ca   : > { %v600_v34 = vpop.f32.mrf.mxu1 }
 0x1cb   : > { %737 = vst [vmem:[%s1152_s25 + $0x50] sm:$0xff] %v705_v33  ;;  %v703_v35 = vmax.f32 %v600_v34, 0.0 }
 0x1cc   : > { %v981_v36 = vpop.f32.mrf.mxu1 }
 0x1cd   : > { %735 = vst [vmem:[%s1152_s25 + $0x40] sm:$0xff] %v703_v35  ;;  %v706_v37 = vmax.f32 %v981_v36, 0.0 }
 0x1ce   : > { %v603_v38 = vpop.f32.mrf.mxu1 }
 0x1cf   : > { %738 = vst [vmem:[%s1152_s25 + $0x58] sm:$0xff] %v706_v37  ;;  %v704_v39 = vmax.f32 %v603_v38, 0.0 }
 0x1d0   : > { %v984_v40 = vpop.f32.mrf.mxu1 }
 0x1d1   : > { %736 = vst [vmem:[%s1152_s25 + $0x48] sm:$0xff] %v704_v39  ;;  %v709_v41 = vmax.f32 %v984_v40, 0.0 }
 0x1d2   : > { %v616_v42 = vpop.f32.mrf.mxu1 }
 0x1d3   : > { %741 = vst [vmem:[%s1152_s25 + $0x70] sm:$0xff] %v709_v41  ;;  %v707_v43 = vmax.f32 %v616_v42, 0.0 }
 0x1d4   : > { %v985_v44 = vpop.f32.mrf.mxu1 }
 0x1d5   : > { %739 = vst [vmem:[%s1152_s25 + $0x60] sm:$0xff] %v707_v43  ;;  %v710_v45 = vmax.f32 %v985_v44, 0.0 }
 0x1d6   : > { %v619_v46 = vpop.f32.mrf.mxu1 }
 0x1d7   : > { %742 = vst [vmem:[%s1152_s25 + $0x78] sm:$0xff] %v710_v45  ;;  %v708_v47 = vmax.f32 %v619_v46, 0.0 }
 0x1d8   : > { %v988_v48 = vpop.f32.mrf.mxu1 }
 0x1d9   : > { %740 = vst [vmem:[%s1152_s25 + $0x68] sm:$0xff] %v708_v47  ;;  %v713_v49 = vmax.f32 %v988_v48, 0.0 }
 0x1da   : > { %v632_v50 = vpop.f32.mrf.mxu1 }
 0x1db   : > { %745 = vst [vmem:[%s1152_s25 + $0x90] sm:$0xff] %v713_v49  ;;  %v711_v51 = vmax.f32 %v632_v50, 0.0 }
 0x1dc   : > { %v989_v52 = vpop.f32.mrf.mxu1 }
 0x1dd   : > { %743 = vst [vmem:[%s1152_s25 + $0x80] sm:$0xff] %v711_v51  ;;  %v714_v53 = vmax.f32 %v989_v52, 0.0 }
 0x1de   : > { %v635_v54 = vpop.f32.mrf.mxu1 }
 0x1df   : > { %746 = vst [vmem:[%s1152_s25 + $0x98] sm:$0xff] %v714_v53  ;;  %v712_v55 = vmax.f32 %v635_v54, 0.0 }
 0x1e0   : > { %v992_v56 = vpop.f32.mrf.mxu1 }
 0x1e1   : > { %744 = vst [vmem:[%s1152_s25 + $0x88] sm:$0xff] %v712_v55  ;;  %v717_v57 = vmax.f32 %v992_v56, 0.0 }
 0x1e2   : > { %v648_v58 = vpop.f32.mrf.mxu1 }
 0x1e3   : > { %749 = vst [vmem:[%s1152_s25 + $0xb0] sm:$0xff] %v717_v57  ;;  %v715_v59 = vmax.f32 %v648_v58, 0.0 }
 0x1e4   : > { %v993_v60 = vpop.f32.mrf.mxu1 }
 0x1e5   : > { %747 = vst [vmem:[%s1152_s25 + $0xa0] sm:$0xff] %v715_v59  ;;  %v718_v61 = vmax.f32 %v993_v60, 0.0 }
 0x1e6   : > { %v651_v62 = vpop.f32.mrf.mxu1 }
 0x1e7   : > { %750 = vst [vmem:[%s1152_s25 + $0xb8] sm:$0xff] %v718_v61  ;;  %v716_v63 = vmax.f32 %v651_v62, 0.0 }
 0x1e8   : > { %v996_v0 = vpop.f32.mrf.mxu1 }
 0x1e9   : > { %748 = vst [vmem:[%s1152_s25 + $0xa8] sm:$0xff] %v716_v63  ;;  %v721_v1 = vmax.f32 %v996_v0, 0.0 }
 0x1ea   : > { %v664_v2 = vpop.f32.mrf.mxu1 }
 0x1eb   : > { %753 = vst [vmem:[%s1152_s25 + $0xd0] sm:$0xff] %v721_v1  ;;  %v719_v3 = vmax.f32 %v664_v2, 0.0 }
 0x1ec   : > { %v997_v4 = vpop.f32.mrf.mxu1 }
 0x1ed   : > { %751 = vst [vmem:[%s1152_s25 + $0xc0] sm:$0xff] %v719_v3  ;;  %v722_v5 = vmax.f32 %v997_v4, 0.0 }
 0x1ee   : > { %v667_v6 = vpop.f32.mrf.mxu1 }
 0x1ef   : > { %754 = vst [vmem:[%s1152_s25 + $0xd8] sm:$0xff] %v722_v5  ;;  %v720_v7 = vmax.f32 %v667_v6, 0.0 }
 0x1f0   : > { %v1000_v8 = vpop.f32.mrf.mxu1 }
 0x1f1   : > { %752 = vst [vmem:[%s1152_s25 + $0xc8] sm:$0xff] %v720_v7  ;;  %v725_v9 = vmax.f32 %v1000_v8, 0.0 }
 0x1f2   : > { %v680_v10 = vpop.f32.mrf.mxu1 }
 0x1f3   : > { %757 = vst [vmem:[%s1152_s25 + $0xf0] sm:$0xff] %v725_v9  ;;  %v723_v11 = vmax.f32 %v680_v10, 0.0 }
 0x1f4   : > { %v1001_v12 = vpop.f32.mrf.mxu1 }
 0x1f5   : > { %755 = vst [vmem:[%s1152_s25 + $0xe0] sm:$0xff] %v723_v11  ;;  %v726_v13 = vmax.f32 %v1001_v12, 0.0 }
 0x1f6   : > { %v683_v14 = vpop.f32.mrf.mxu1 }
 0x1f7   : > { %758 = vst [vmem:[%s1152_s25 + $0xf8] sm:$0xff] %v726_v13  ;;  %v724_v15 = vmax.f32 %v683_v14, 0.0 }
 0x1f9   : > { %756 = vst [vmem:[%s1152_s25 + $0xe8] sm:$0xff] %v724_v15 }
 0x1fa PF: > { %s12_s9 = sadd.s32 1, %s1032_s9  }
 0x1fb   : > { %p9_p4 = scmp.ge.s32.totalorder %s12_s9, 4  }
 0x1fd   :  { %11 = sbr.rel (!%p9_p4) target bundleno = 1 (0x1), region = 59 }

</bundles_post_ra>
